<compile_context>
chip_gen: v7x
topology: tpu7x:2x2x1
jax: 0.10.0
libtpu: 0.0.40
codegen_flags: <defaults>
</compile_context>

<pallas_src>
import functools
import math

import jax
import jax.numpy as jnp
from jax.experimental import pallas as pl
from jax.experimental.pallas import tpu as pltpu


# ---------------------------------------------------------------------------
# Per-generation configuration (VMEM budget + default matmul tiles)
# ---------------------------------------------------------------------------
@functools.lru_cache(maxsize=None)
def _device_config():
    vmem_bytes = 64 * 1024 * 1024  # conservative default (v7x-sized)
    try:
        info = pltpu.get_tpu_info()
        for attr in ("vmem_capacity_bytes", "vmem_size_bytes", "vmem_bytes"):
            v = getattr(info, attr, None)
            if v:
                vmem_bytes = int(v)
                break
    except Exception:
        pass
    if vmem_bytes >= 96 * 1024 * 1024:
        # v5e / v6e: 128 MiB physical VMEM -> large tiles, raised scoped limit.
        return {"vmem_limit_bytes": 96 * 1024 * 1024, "tm": 512, "tn": 512, "tk": 512}
    # v7x: 64 MiB physical VMEM -> leave headroom for double-buffered inputs.
    return {"vmem_limit_bytes": 40 * 1024 * 1024, "tm": 256, "tn": 256, "tk": 512}


def _pick_block(full, target, align):
    """Largest `align`-aligned block <= target that divides `full`."""
    if full <= target:
        return full
    t = (min(target, full) // align) * align
    while t >= align:
        if full % t == 0:
            return t
        t -= align
    # No aligned divisor <= target: guard against silently producing a huge
    # block (VMEM blowout).  Allow a modest fallback, otherwise ask for padding.
    if full <= 2 * target:
        return full
    raise ValueError(
        f"axis of size {full} has no {align}-aligned divisor <= {target}; "
        "pad the axis or pick a different block size")


# ---------------------------------------------------------------------------
# Tiled linear projection: y = x @ w   (w pre-transposed offline to (K, N))
# ---------------------------------------------------------------------------
def _matmul_kernel(x_ref, w_ref, o_ref, acc_ref):
    @pl.when(pl.program_id(2) == 0)
    def _():
        acc_ref[...] = jnp.zeros_like(acc_ref)

    acc_ref[...] += jnp.dot(x_ref[...], w_ref[...],
                            preferred_element_type=jnp.float32)

    @pl.when(pl.program_id(2) == pl.num_programs(2) - 1)
    def _():
        o_ref[...] = acc_ref[...].astype(o_ref.dtype)


def linear(x, w, *, tm=None, tn=None, tk=None):
    """x: (M, K), w: (K, N) -> (M, N), tiled + pipelined, K axis last."""
    M, K = x.shape
    K2, N = w.shape
    assert K == K2
    cfg = _device_config()
    tm = _pick_block(M, tm or cfg["tm"], 128)
    tn = _pick_block(N, tn or cfg["tn"], 128)
    tk = _pick_block(K, tk or cfg["tk"], 128)
    grid = (M // tm, N // tn, K // tk)
    # NOTE(v7x, 2 TCs): M collapses to one tile at decode time; the N axis is
    # also "parallel" so both TensorCores stay busy whenever N // tn >= 2.
    return pl.pallas_call(
        _matmul_kernel,
        out_shape=jax.ShapeDtypeStruct((M, N), x.dtype),
        grid_spec=pltpu.PrefetchScalarGridSpec(
            num_scalar_prefetch=0,
            grid=grid,
            in_specs=[
                pl.BlockSpec((tm, tk), lambda i, j, k: (i, k)),
                pl.BlockSpec((tk, tn), lambda i, j, k: (k, j)),
            ],
            out_specs=pl.BlockSpec((tm, tn), lambda i, j, k: (i, j)),
            scratch_shapes=[pltpu.VMEM((tm, tn), jnp.float32)],
        ),
        compiler_params=pltpu.CompilerParams(
            dimension_semantics=("parallel", "parallel", "arbitrary"),
            vmem_limit_bytes=cfg["vmem_limit_bytes"],
        ),
    )(x, w)


# ---------------------------------------------------------------------------
# Flash attention: query-tiled, online softmax, GQA head-fold (zero-copy)
# ---------------------------------------------------------------------------
def _flash_attn_kernel(q_ref, k_ref, v_ref, o_ref,
                       q_sc, m_sc, l_sc, acc_sc, *, sm_scale):
    kv = pl.program_id(3)
    block_q = q_ref.shape[1]
    n_rep = q_ref.shape[3]
    d = q_ref.shape[4]
    rows = block_q * n_rep

    @pl.when(kv == 0)
    def _():
        # Scale Q once per Q-block (hoisted out of the KV loop); the Q block is
        # resident across the kv axis so this runs once, not Skv/block_kv times.
        q = q_ref[...].reshape(rows, d)
        q_sc[...] = (q.astype(jnp.float32) * sm_scale).astype(q_sc.dtype)
        m_sc[...] = jnp.full_like(m_sc, -jnp.inf)
        l_sc[...] = jnp.zeros_like(l_sc)
        acc_sc[...] = jnp.zeros_like(acc_sc)

    k = k_ref[0, 0]                     # (block_kv, D)
    v = v_ref[0, 0]                     # (block_kv, D)

    # Scores: contract on head_dim, no transpose of K inside the kernel.
    s = jax.lax.dot_general(
        q_sc[...], k,
        dimension_numbers=(((1,), (1,)), ((), ())),
        preferred_element_type=jnp.float32,
    )                                   # (rows, block_kv), f32

    m_prev = m_sc[...]
    m_new = jnp.maximum(m_prev, jnp.max(s, axis=-1, keepdims=True))
    alpha = jnp.exp(m_prev - m_new)
    p = jnp.exp(s - m_new)              # softmax numerator in f32
    l_sc[...] = alpha * l_sc[...] + jnp.sum(p, axis=-1, keepdims=True)
    acc_sc[...] = alpha * acc_sc[...] + jax.lax.dot_general(
        p.astype(v.dtype), v,
        dimension_numbers=(((1,), (0,)), ((), ())),
        preferred_element_type=jnp.float32,
    )
    m_sc[...] = m_new

    @pl.when(kv == pl.num_programs(3) - 1)
    def _():
        out = acc_sc[...] / l_sc[...]   # exact normalize (f32 parity with ref)
        o_ref[...] = out.reshape(o_ref.shape).astype(o_ref.dtype)


def flash_attention(q, k_cache, v_cache, *, skv, sm_scale,
                    block_q=None, block_kv=512):
    """q: (B, S, Hkv, n_rep, D) -- query heads folded per KV head.
       k_cache / v_cache: (max_batch, Hkv, max_seq, D); only [:B, :, :skv] is
       read (via the grid), so the cache is never sliced/transposed in HBM.

    Grid = (B, Hkv, S/block_q, Skv/block_kv); the KV axis is last and
    "arbitrary" with the output block resident across it (online softmax in
    VMEM scratch).  Each K/V tile is DMA'd once per KV head (n_rep-fold HBM
    traffic saving vs. iterating query heads)."""
    B, S, Hkv, n_rep, D = q.shape
    maxB, Hkv2, maxS, D2 = k_cache.shape
    assert Hkv == Hkv2 and D == D2 and B <= maxB and skv <= maxS

    kv_align = 16 if jnp.dtype(k_cache.dtype).itemsize == 2 else 8
    if block_q is None:
        block_q = max(8, 256 // n_rep)  # keep block_q * n_rep ~ 256 rows
    block_q = _pick_block(S, block_q, 8)
    block_kv = _pick_block(skv, block_kv, kv_align)
    rows = block_q * n_rep

    grid = (B, Hkv, S // block_q, skv // block_kv)
    q_map = lambda b, h, qi, kv: (b, qi, h, 0, 0)
    kv_map = lambda b, h, qi, kv: (b, h, kv, 0)

    cfg = _device_config()
    kernel = functools.partial(_flash_attn_kernel, sm_scale=sm_scale)

    return pl.pallas_call(
        kernel,
        out_shape=jax.ShapeDtypeStruct((B, S, Hkv, n_rep, D), q.dtype),
        grid_spec=pltpu.PrefetchScalarGridSpec(
            num_scalar_prefetch=0,
            grid=grid,
            in_specs=[
                pl.BlockSpec((1, block_q, 1, n_rep, D), q_map),
                pl.BlockSpec((1, 1, block_kv, D), kv_map),
                pl.BlockSpec((1, 1, block_kv, D), kv_map),
            ],
            out_specs=pl.BlockSpec((1, block_q, 1, n_rep, D), q_map),
            scratch_shapes=[
                pltpu.VMEM((rows, D), q.dtype),      # pre-scaled Q
                pltpu.VMEM((rows, 1), jnp.float32),  # running max
                pltpu.VMEM((rows, 1), jnp.float32),  # running denominator
                pltpu.VMEM((rows, D), jnp.float32),  # unnormalized output acc
            ],
        ),
        compiler_params=pltpu.CompilerParams(
            dimension_semantics=("parallel", "parallel", "parallel", "arbitrary"),
            vmem_limit_bytes=cfg["vmem_limit_bytes"],
        ),
    )(q, k_cache, v_cache)


# ---------------------------------------------------------------------------
# Plain-JAX glue (matches the PyTorch reference semantics)
# ---------------------------------------------------------------------------
def precompute_rope_cos_sin(head_dim, seq_len, theta=10000.0):
    inv_freq = 1.0 / (theta ** (jnp.arange(0, head_dim, 2, dtype=jnp.float32) / head_dim))
    t = jnp.arange(seq_len, dtype=jnp.float32)
    ang = jnp.outer(t, inv_freq)                  # (seq_len, head_dim // 2)
    return jnp.cos(ang), jnp.sin(ang)


# TODO(synk): fuse RoPE into the QKV-projection epilogue (cos/sin tables in
# VMEM); the interleaved (even, odd) pair layout of view_as_complex needs an
# even/odd lane swizzle rather than a plain half-rotation, so it stays as XLA
# glue here.
def apply_rope(x, cos, sin):
    """Interleaved-pair rotary embedding == torch.view_as_complex semantics.
    x: (B, S, H, D); cos/sin: (S, D//2)."""
    B, S, H, D = x.shape
    xf = x.astype(jnp.float32).reshape(B, S, H, D // 2, 2)
    xr, xi = xf[..., 0], xf[..., 1]
    c = cos[None, :, None, :]
    s = sin[None, :, None, :]
    out = jnp.stack([xr * c - xi * s, xr * s + xi * c], axis=-1).reshape(B, S, H, D)
    return out.astype(x.dtype)


@functools.partial(
    jax.jit,
    static_argnames=("start_pos", "n_heads_q", "n_kv_heads", "head_dim",
                     "block_q", "block_kv"),
    donate_argnames=("cache_k", "cache_v"),
)
def self_attention_forward(x, rope_cos, rope_sin, params, cache_k, cache_v, *,
                           start_pos, n_heads_q, n_kv_heads, head_dim,
                           block_q=None, block_kv=512):
    B, S, dim = x.shape
    n_rep = n_heads_q // n_kv_heads
    q_width = n_heads_q * head_dim
    kv_width = n_kv_heads * head_dim
    skv = start_pos + S                        # static (start_pos is static)

    # Fused QKV projection: one pallas_call, x read once.
    x2 = x.reshape(B * S, dim)
    qkv = linear(x2, params["w_qkv_t"])        # (B*S, q_width + 2*kv_width)
    # TODO(synk): emit q/k/v as separate lane-aligned projection outputs to
    # avoid these XLA slice copies (minor next to the matmuls).
    q = qkv[:, :q_width].reshape(B, S, n_heads_q, head_dim)
    k = qkv[:, q_width:q_width + kv_width].reshape(B, S, n_kv_heads, head_dim)
    v = qkv[:, q_width + kv_width:].reshape(B, S, n_kv_heads, head_dim)

    q = apply_rope(q, rope_cos, rope_sin)
    k = apply_rope(k, rope_cos, rope_sin)

    # KV cache is stored head-major (max_batch, Hkv, max_seq, D): only the S
    # new tokens get transposed here (cheap; S=1 at decode), the cached prefix
    # is never copied or transposed, and the attention kernel indexes the full
    # cache in place (caches are donated -> in-place HBM update).
    cache_k = jax.lax.dynamic_update_slice(
        cache_k, k.transpose(0, 2, 1, 3).astype(cache_k.dtype), (0, 0, start_pos, 0))
    cache_v = jax.lax.dynamic_update_slice(
        cache_v, v.transpose(0, 2, 1, 3).astype(cache_v.dtype), (0, 0, start_pos, 0))

    # Queries stay in (B, S, H, D) order; fold the n_rep query heads of each KV
    # head into the block (zero-copy GQA: K/V DMA'd once per KV head).
    q5 = q.reshape(B, S, n_kv_heads, n_rep, head_dim)

    out = flash_attention(q5, cache_k, cache_v, skv=skv,
                          sm_scale=1.0 / math.sqrt(head_dim),
                          block_q=block_q, block_kv=block_kv)
    # (B, S, Hkv, n_rep, D) flattens straight to (B*S, Hq*D) -- no transpose.
    out = out.reshape(B * S, q_width)

    out = linear(out, params["w_o_t"]).reshape(B, S, dim)
    return out, cache_k, cache_v


# ---------------------------------------------------------------------------
# Demo
# ---------------------------------------------------------------------------
if __name__ == "__main__":
    # Small, consistent shapes.
    B, S, dim, n_heads = 2, 16, 32, 4
    n_kv_heads = n_heads                 # spec default: n_kv_heads = n_heads
    head_dim = dim // n_heads            # 8
    max_batch_size, max_seq_len = 4, 32
    start_pos = 0

    key = jax.random.PRNGKey(0)
    k1, k2, k3, k4, k5 = jax.random.split(key, 5)
    w_scale = 1.0 / math.sqrt(dim)
    wq = jax.random.normal(k1, (n_heads * head_dim, dim), jnp.float32) * w_scale
    wk = jax.random.normal(k2, (n_kv_heads * head_dim, dim), jnp.float32) * w_scale
    wv = jax.random.normal(k3, (n_kv_heads * head_dim, dim), jnp.float32) * w_scale
    wo = jax.random.normal(k4, (dim, n_heads * head_dim), jnp.float32) * w_scale
    params = {
        # One-time checkpoint-conversion work: fuse QKV and pre-transpose the
        # PyTorch (N, K) weights to (K, N) so every grid step is MXU-native.
        "w_qkv_t": jnp.concatenate([wq, wk, wv], axis=0).T,   # (dim, q+2*kv)
        "w_o_t": wo.T,                                        # (Hq*D, dim)
    }

    x = jax.random.normal(k5, (B, S, dim), jnp.float32)
    cos_all, sin_all = precompute_rope_cos_sin(head_dim, max_seq_len)
    rope_cos = cos_all[start_pos:start_pos + S]
    rope_sin = sin_all[start_pos:start_pos + S]

    # KV cache stored head-major: (max_batch, Hkv, max_seq, D).
    cache_k = jnp.zeros((max_batch_size, n_kv_heads, max_seq_len, head_dim), jnp.float32)
    cache_v = jnp.zeros((max_batch_size, n_kv_heads, max_seq_len, head_dim), jnp.float32)

    out, cache_k, cache_v = self_attention_forward(
        x, rope_cos, rope_sin, params, cache_k, cache_v,
        start_pos=start_pos, n_heads_q=n_heads, n_kv_heads=n_kv_heads,
        head_dim=head_dim,
        block_kv=8,   # Skv=16 -> 2 KV tiles: exercises the online-softmax path
    )
    jax.block_until_ready(out)
    assert out.shape == (B, S, dim)
    print("KERNEL_OK")
</pallas_src>

<mosaic_0001>
module attributes {stable_mosaic.version = 11 : i64} {
  func.func @_matmul_kernel(%arg0: i32, %arg1: i32, %arg2: i32, %arg3: memref<32x32xf32, #tpu.memory_space<vmem>>, %arg4: memref<32x96xf32, #tpu.memory_space<vmem>>, %arg5: memref<32x96xf32, #tpu.memory_space<vmem>>, %arg6: memref<32x96xf32, #tpu.memory_space<vmem>>) attributes {dimension_semantics = [#tpu.dimension_semantics<parallel>, #tpu.dimension_semantics<parallel>, #tpu.dimension_semantics<arbitrary>], iteration_bounds = array<i64: 1, 1, 1>, scalar_prefetch = 0 : i64, scratch_operands = 1 : i64, tpu.core_type = #tpu.core_type<tc>, window_params = [{transform_indices = @transform_0, window_bounds = array<i64: 32, 32>}, {transform_indices = @transform_1, window_bounds = array<i64: 32, 96>}, {transform_indices = @transform_2, window_bounds = array<i64: 32, 96>}]} {
    %c0_i32 = arith.constant 0 : i32
    %0 = arith.cmpi eq, %arg2, %c0_i32 : i32
    %1 = arith.extui %0 : i1 to i32
    %c0_i32_0 = arith.constant 0 : i32
    %2 = arith.cmpi ne, %1, %c0_i32_0 : i32
    scf.if %2 {
      %cst_10 = arith.constant 0.000000e+00 : f32
      %12 = vector.broadcast %cst_10 : f32 to vector<32x96xf32>
      %c0_11 = arith.constant 0 : index
      %c0_12 = arith.constant 0 : index
      %13 = vector.load %arg6[%c0_11, %c0_12] : memref<32x96xf32, #tpu.memory_space<vmem>>, vector<32x96xf32>
      tpu.vector_store %arg6[%c0_11, %c0_12], %12 {strides = array<i32>} : memref<32x96xf32, #tpu.memory_space<vmem>>, vector<32x96xf32>,
    } else {
    }
    %c0 = arith.constant 0 : index
    %c0_1 = arith.constant 0 : index
    %3 = vector.load %arg6[%c0, %c0_1] : memref<32x96xf32, #tpu.memory_space<vmem>>, vector<32x96xf32>
    %c0_2 = arith.constant 0 : index
    %c0_3 = arith.constant 0 : index
    %4 = vector.load %arg3[%c0_2, %c0_3] : memref<32x32xf32, #tpu.memory_space<vmem>>, vector<32x32xf32>
    %c0_4 = arith.constant 0 : index
    %c0_5 = arith.constant 0 : index
    %5 = vector.load %arg4[%c0_4, %c0_5] : memref<32x96xf32, #tpu.memory_space<vmem>>, vector<32x96xf32>
    %cst = arith.constant dense<0.000000e+00> : vector<32x96xf32>
    %6 = tpu.matmul %4, %5, %cst {dimension_numbers = #tpu.dot_dimension_numbers<[1], [0], [0], [1], [0, 0, 1, 1], [], []>} : vector<32x32xf32>, vector<32x96xf32>, vector<32x96xf32> -> vector<32x96xf32>
    %7 = arith.addf %3, %6 : vector<32x96xf32>
    %c0_6 = arith.constant 0 : index
    %c0_7 = arith.constant 0 : index
    %8 = vector.load %arg6[%c0_6, %c0_7] : memref<32x96xf32, #tpu.memory_space<vmem>>, vector<32x96xf32>
    tpu.vector_store %arg6[%c0_6, %c0_7], %7 {strides = array<i32>} : memref<32x96xf32, #tpu.memory_space<vmem>>, vector<32x96xf32>,
    %c0_i32_8 = arith.constant 0 : i32
    %9 = arith.cmpi eq, %arg2, %c0_i32_8 : i32
    %10 = arith.extui %9 : i1 to i32
    %c0_i32_9 = arith.constant 0 : i32
    %11 = arith.cmpi ne, %10, %c0_i32_9 : i32
    scf.if %11 {
      %c0_10 = arith.constant 0 : index
      %c0_11 = arith.constant 0 : index
      %12 = vector.load %arg6[%c0_10, %c0_11] : memref<32x96xf32, #tpu.memory_space<vmem>>, vector<32x96xf32>
      %c0_12 = arith.constant 0 : index
      %c0_13 = arith.constant 0 : index
      %13 = vector.load %arg5[%c0_12, %c0_13] : memref<32x96xf32, #tpu.memory_space<vmem>>, vector<32x96xf32>
      tpu.vector_store %arg5[%c0_12, %c0_13], %12 {strides = array<i32>} : memref<32x96xf32, #tpu.memory_space<vmem>>, vector<32x96xf32>,
    } else {
    }
    return
  }
  func.func @transform_0(%arg0: i32, %arg1: i32, %arg2: i32) -> (i32, i32) {
    %c0_i32 = arith.constant 0 : i32
    return %arg0, %arg2 : i32, i32
  }
  func.func @transform_1(%arg0: i32, %arg1: i32, %arg2: i32) -> (i32, i32) {
    %c0_i32 = arith.constant 0 : i32
    return %arg2, %arg1 : i32, i32
  }
  func.func @transform_2(%arg0: i32, %arg1: i32, %arg2: i32) -> (i32, i32) {
    %c0_i32 = arith.constant 0 : i32
    return %arg0, %arg1 : i32, i32
  }
}

module attributes {stable_mosaic.version = 11 : i64} {
  func.func @_flash_attn_kernel(%arg0: i32, %arg1: i32, %arg2: i32, %arg3: i32, %arg4: memref<1x16x1x1x8xf32, #tpu.memory_space<vmem>>, %arg5: memref<1x1x8x8xf32, #tpu.memory_space<vmem>>, %arg6: memref<1x1x8x8xf32, #tpu.memory_space<vmem>>, %arg7: memref<1x16x1x1x8xf32, #tpu.memory_space<vmem>>, %arg8: memref<16x8xf32, #tpu.memory_space<vmem>>, %arg9: memref<16x1xf32, #tpu.memory_space<vmem>>, %arg10: memref<16x1xf32, #tpu.memory_space<vmem>>, %arg11: memref<16x8xf32, #tpu.memory_space<vmem>>) attributes {dimension_semantics = [#tpu.dimension_semantics<parallel>, #tpu.dimension_semantics<parallel>, #tpu.dimension_semantics<parallel>, #tpu.dimension_semantics<arbitrary>], iteration_bounds = array<i64: 2, 4, 1, 2>, scalar_prefetch = 0 : i64, scratch_operands = 4 : i64, tpu.core_type = #tpu.core_type<tc>, window_params = [{transform_indices = @transform_0, window_bounds = array<i64: 1, 16, 1, 1, 8>}, {transform_indices = @transform_1, window_bounds = array<i64: 1, 1, 8, 8>}, {transform_indices = @transform_2, window_bounds = array<i64: 1, 1, 8, 8>}, {transform_indices = @transform_3, window_bounds = array<i64: 1, 16, 1, 1, 8>}]} {
    %c0_i32 = arith.constant 0 : i32
    %0 = arith.cmpi eq, %arg3, %c0_i32 : i32
    %1 = arith.extui %0 : i1 to i32
    %c0_i32_0 = arith.constant 0 : i32
    %2 = arith.cmpi ne, %1, %c0_i32_0 : i32
    scf.if %2 {
      %c0_26 = arith.constant 0 : index
      %c0_27 = arith.constant 0 : index
      %c0_28 = arith.constant 0 : index
      %c0_29 = arith.constant 0 : index
      %c0_30 = arith.constant 0 : index
      %34 = vector.load %arg4[%c0_26, %c0_27, %c0_28, %c0_29, %c0_30] : memref<1x16x1x1x8xf32, #tpu.memory_space<vmem>>, vector<1x16x1x1x8xf32>
      %35 = vector.shape_cast %34 : vector<1x16x1x1x8xf32> to vector<16x8xf32>
      %cst_31 = arith.constant 0.353553385 : f32
      %36 = vector.broadcast %cst_31 : f32 to vector<16x8xf32>
      %37 = arith.mulf %35, %36 : vector<16x8xf32>
      %c0_32 = arith.constant 0 : index
      %c0_33 = arith.constant 0 : index
      %38 = vector.load %arg8[%c0_32, %c0_33] : memref<16x8xf32, #tpu.memory_space<vmem>>, vector<16x8xf32>
      tpu.vector_store %arg8[%c0_32, %c0_33], %37 {strides = array<i32>} : memref<16x8xf32, #tpu.memory_space<vmem>>, vector<16x8xf32>,
      %cst_34 = arith.constant 0xFF800000 : f32
      %39 = vector.broadcast %cst_34 : f32 to vector<16x1xf32>
      %c0_35 = arith.constant 0 : index
      %c0_36 = arith.constant 0 : index
      %40 = vector.load %arg9[%c0_35, %c0_36] : memref<16x1xf32, #tpu.memory_space<vmem>>, vector<16x1xf32>
      tpu.vector_store %arg9[%c0_35, %c0_36], %39 {strides = array<i32>} : memref<16x1xf32, #tpu.memory_space<vmem>>, vector<16x1xf32>,
      %cst_37 = arith.constant 0.000000e+00 : f32
      %41 = vector.broadcast %cst_37 : f32 to vector<16x1xf32>
      %c0_38 = arith.constant 0 : index
      %c0_39 = arith.constant 0 : index
      %42 = vector.load %arg10[%c0_38, %c0_39] : memref<16x1xf32, #tpu.memory_space<vmem>>, vector<16x1xf32>
      tpu.vector_store %arg10[%c0_38, %c0_39], %41 {strides = array<i32>} : memref<16x1xf32, #tpu.memory_space<vmem>>, vector<16x1xf32>,
      %cst_40 = arith.constant 0.000000e+00 : f32
      %43 = vector.broadcast %cst_40 : f32 to vector<16x8xf32>
      %c0_41 = arith.constant 0 : index
      %c0_42 = arith.constant 0 : index
      %44 = vector.load %arg11[%c0_41, %c0_42] : memref<16x8xf32, #tpu.memory_space<vmem>>, vector<16x8xf32>
      tpu.vector_store %arg11[%c0_41, %c0_42], %43 {strides = array<i32>} : memref<16x8xf32, #tpu.memory_space<vmem>>, vector<16x8xf32>,
    } else {
    }
    %c0 = arith.constant 0 : index
    %c0_1 = arith.constant 0 : index
    %c0_2 = arith.constant 0 : index
    %c0_3 = arith.constant 0 : index
    %3 = vector.load %arg5[%c0, %c0_1, %c0_2, %c0_3] : memref<1x1x8x8xf32, #tpu.memory_space<vmem>>, vector<1x1x8x8xf32>
    %4 = vector.shape_cast %3 : vector<1x1x8x8xf32> to vector<8x8xf32>
    %c0_4 = arith.constant 0 : index
    %c0_5 = arith.constant 0 : index
    %c0_6 = arith.constant 0 : index
    %c0_7 = arith.constant 0 : index
    %5 = vector.load %arg6[%c0_4, %c0_5, %c0_6, %c0_7] : memref<1x1x8x8xf32, #tpu.memory_space<vmem>>, vector<1x1x8x8xf32>
    %6 = vector.shape_cast %5 : vector<1x1x8x8xf32> to vector<8x8xf32>
    %c0_8 = arith.constant 0 : index
    %c0_9 = arith.constant 0 : index
    %7 = vector.load %arg8[%c0_8, %c0_9] : memref<16x8xf32, #tpu.memory_space<vmem>>, vector<16x8xf32>
    %cst = arith.constant dense<0.000000e+00> : vector<16x8xf32>
    %8 = tpu.matmul %7, %4, %cst {dimension_numbers = #tpu.dot_dimension_numbers<[1], [1], [0], [0], [0, 0, 1, 0], [], []>} : vector<16x8xf32>, vector<8x8xf32>, vector<16x8xf32> -> vector<16x8xf32>
    %c0_10 = arith.constant 0 : index
    %c0_11 = arith.constant 0 : index
    %9 = vector.load %arg9[%c0_10, %c0_11] : memref<16x1xf32, #tpu.memory_space<vmem>>, vector<16x1xf32>
    %cst_12 = arith.constant dense<0xFF800000> : vector<16xf32>
    %10 = vector.multi_reduction <maximumf>, %8, %cst_12 [1] : vector<16x8xf32> to vector<16xf32>
    %11 = vector.shape_cast %10 : vector<16xf32> to vector<16x1xf32>
    %12 = arith.maximumf %9, %11 : vector<16x1xf32>
    %13 = arith.subf %9, %12 : vector<16x1xf32>
    %14 = math.exp %13 : vector<16x1xf32>
    %15 = vector.broadcast %12 : vector<16x1xf32> to vector<16x8xf32>
    %16 = arith.subf %8, %15 : vector<16x8xf32>
    %17 = math.exp %16 : vector<16x8xf32>
    %c0_13 = arith.constant 0 : index
    %c0_14 = arith.constant 0 : index
    %18 = vector.load %arg10[%c0_13, %c0_14] : memref<16x1xf32, #tpu.memory_space<vmem>>, vector<16x1xf32>
    %19 = arith.mulf %14, %18 : vector<16x1xf32>
    %cst_15 = arith.constant dense<0.000000e+00> : vector<16xf32>
    %20 = vector.multi_reduction <add>, %17, %cst_15 [1] : vector<16x8xf32> to vector<16xf32>
    %21 = vector.shape_cast %20 : vector<16xf32> to vector<16x1xf32>
    %22 = arith.addf %19, %21 : vector<16x1xf32>
    %c0_16 = arith.constant 0 : index
    %c0_17 = arith.constant 0 : index
    %23 = vector.load %arg10[%c0_16, %c0_17] : memref<16x1xf32, #tpu.memory_space<vmem>>, vector<16x1xf32>
    tpu.vector_store %arg10[%c0_16, %c0_17], %22 {strides = array<i32>} : memref<16x1xf32, #tpu.memory_space<vmem>>, vector<16x1xf32>,
    %c0_18 = arith.constant 0 : index
    %c0_19 = arith.constant 0 : index
    %24 = vector.load %arg11[%c0_18, %c0_19] : memref<16x8xf32, #tpu.memory_space<vmem>>, vector<16x8xf32>
    %25 = vector.broadcast %14 : vector<16x1xf32> to vector<16x8xf32>
    %26 = arith.mulf %25, %24 : vector<16x8xf32>
    %cst_20 = arith.constant dense<0.000000e+00> : vector<16x8xf32>
    %27 = tpu.matmul %17, %6, %cst_20 {dimension_numbers = #tpu.dot_dimension_numbers<[1], [0], [0], [1], [0, 0, 1, 1], [], []>} : vector<16x8xf32>, vector<8x8xf32>, vector<16x8xf32> -> vector<16x8xf32>
    %28 = arith.addf %26, %27 : vector<16x8xf32>
    %c0_21 = arith.constant 0 : index
    %c0_22 = arith.constant 0 : index
    %29 = vector.load %arg11[%c0_21, %c0_22] : memref<16x8xf32, #tpu.memory_space<vmem>>, vector<16x8xf32>
    tpu.vector_store %arg11[%c0_21, %c0_22], %28 {strides = array<i32>} : memref<16x8xf32, #tpu.memory_space<vmem>>, vector<16x8xf32>,
    %c0_23 = arith.constant 0 : index
    %c0_24 = arith.constant 0 : index
    %30 = vector.load %arg9[%c0_23, %c0_24] : memref<16x1xf32, #tpu.memory_space<vmem>>, vector<16x1xf32>
    tpu.vector_store %arg9[%c0_23, %c0_24], %12 {strides = array<i32>} : memref<16x1xf32, #tpu.memory_space<vmem>>, vector<16x1xf32>,
    %c1_i32 = arith.constant 1 : i32
    %31 = arith.cmpi eq, %arg3, %c1_i32 : i32
    %32 = arith.extui %31 : i1 to i32
    %c0_i32_25 = arith.constant 0 : i32
    %33 = arith.cmpi ne, %32, %c0_i32_25 : i32
    scf.if %33 {
      %c0_26 = arith.constant 0 : index
      %c0_27 = arith.constant 0 : index
      %34 = vector.load %arg11[%c0_26, %c0_27] : memref<16x8xf32, #tpu.memory_space<vmem>>, vector<16x8xf32>
      %c0_28 = arith.constant 0 : index
      %c0_29 = arith.constant 0 : index
      %35 = vector.load %arg10[%c0_28, %c0_29] : memref<16x1xf32, #tpu.memory_space<vmem>>, vector<16x1xf32>
      %36 = vector.broadcast %35 : vector<16x1xf32> to vector<16x8xf32>
      %37 = arith.divf %34, %36 : vector<16x8xf32>
      %38 = vector.shape_cast %37 : vector<16x8xf32> to vector<1x16x1x1x8xf32>
      %c0_30 = arith.constant 0 : index
      %c0_31 = arith.constant 0 : index
      %c0_32 = arith.constant 0 : index
      %c0_33 = arith.constant 0 : index
      %c0_34 = arith.constant 0 : index
      %39 = vector.load %arg7[%c0_30, %c0_31, %c0_32, %c0_33, %c0_34] : memref<1x16x1x1x8xf32, #tpu.memory_space<vmem>>, vector<1x16x1x1x8xf32>
      tpu.vector_store %arg7[%c0_30, %c0_31, %c0_32, %c0_33, %c0_34], %38 {strides = array<i32>} : memref<1x16x1x1x8xf32, #tpu.memory_space<vmem>>, vector<1x16x1x1x8xf32>,
    } else {
    }
    return
  }
  func.func @transform_0(%arg0: i32, %arg1: i32, %arg2: i32, %arg3: i32) -> (i32, i32, i32, i32, i32) {
    %c0_i32 = arith.constant 0 : i32
    %c0_i32_0 = arith.constant 0 : i32
    %c0_i32_1 = arith.constant 0 : i32
    return %arg0, %arg2, %arg1, %c0_i32, %c0_i32_0 : i32, i32, i32, i32, i32
  }
  func.func @transform_1(%arg0: i32, %arg1: i32, %arg2: i32, %arg3: i32) -> (i32, i32, i32, i32) {
    %c0_i32 = arith.constant 0 : i32
    %c0_i32_0 = arith.constant 0 : i32
    return %arg0, %arg1, %arg3, %c0_i32 : i32, i32, i32, i32
  }
  func.func @transform_2(%arg0: i32, %arg1: i32, %arg2: i32, %arg3: i32) -> (i32, i32, i32, i32) {
    %c0_i32 = arith.constant 0 : i32
    %c0_i32_0 = arith.constant 0 : i32
    return %arg0, %arg1, %arg3, %c0_i32 : i32, i32, i32, i32
  }
  func.func @transform_3(%arg0: i32, %arg1: i32, %arg2: i32, %arg3: i32) -> (i32, i32, i32, i32, i32) {
    %c0_i32 = arith.constant 0 : i32
    %c0_i32_0 = arith.constant 0 : i32
    %c0_i32_1 = arith.constant 0 : i32
    return %arg0, %arg2, %arg1, %c0_i32, %c0_i32_0 : i32, i32, i32, i32, i32
  }
}

module attributes {stable_mosaic.version = 11 : i64} {
  func.func @_matmul_kernel(%arg0: i32, %arg1: i32, %arg2: i32, %arg3: memref<32x32xf32, #tpu.memory_space<vmem>>, %arg4: memref<32x32xf32, #tpu.memory_space<vmem>>, %arg5: memref<32x32xf32, #tpu.memory_space<vmem>>, %arg6: memref<32x32xf32, #tpu.memory_space<vmem>>) attributes {dimension_semantics = [#tpu.dimension_semantics<parallel>, #tpu.dimension_semantics<parallel>, #tpu.dimension_semantics<arbitrary>], iteration_bounds = array<i64: 1, 1, 1>, scalar_prefetch = 0 : i64, scratch_operands = 1 : i64, tpu.core_type = #tpu.core_type<tc>, window_params = [{transform_indices = @transform_0, window_bounds = array<i64: 32, 32>}, {transform_indices = @transform_1, window_bounds = array<i64: 32, 32>}, {transform_indices = @transform_2, window_bounds = array<i64: 32, 32>}]} {
    %c0_i32 = arith.constant 0 : i32
    %0 = arith.cmpi eq, %arg2, %c0_i32 : i32
    %1 = arith.extui %0 : i1 to i32
    %c0_i32_0 = arith.constant 0 : i32
    %2 = arith.cmpi ne, %1, %c0_i32_0 : i32
    scf.if %2 {
      %cst_10 = arith.constant 0.000000e+00 : f32
      %12 = vector.broadcast %cst_10 : f32 to vector<32x32xf32>
      %c0_11 = arith.constant 0 : index
      %c0_12 = arith.constant 0 : index
      %13 = vector.load %arg6[%c0_11, %c0_12] : memref<32x32xf32, #tpu.memory_space<vmem>>, vector<32x32xf32>
      tpu.vector_store %arg6[%c0_11, %c0_12], %12 {strides = array<i32>} : memref<32x32xf32, #tpu.memory_space<vmem>>, vector<32x32xf32>,
    } else {
    }
    %c0 = arith.constant 0 : index
    %c0_1 = arith.constant 0 : index
    %3 = vector.load %arg6[%c0, %c0_1] : memref<32x32xf32, #tpu.memory_space<vmem>>, vector<32x32xf32>
    %c0_2 = arith.constant 0 : index
    %c0_3 = arith.constant 0 : index
    %4 = vector.load %arg3[%c0_2, %c0_3] : memref<32x32xf32, #tpu.memory_space<vmem>>, vector<32x32xf32>
    %c0_4 = arith.constant 0 : index
    %c0_5 = arith.constant 0 : index
    %5 = vector.load %arg4[%c0_4, %c0_5] : memref<32x32xf32, #tpu.memory_space<vmem>>, vector<32x32xf32>
    %cst = arith.constant dense<0.000000e+00> : vector<32x32xf32>
    %6 = tpu.matmul %4, %5, %cst {dimension_numbers = #tpu.dot_dimension_numbers<[1], [0], [0], [1], [0, 0, 1, 1], [], []>} : vector<32x32xf32>, vector<32x32xf32>, vector<32x32xf32> -> vector<32x32xf32>
    %7 = arith.addf %3, %6 : vector<32x32xf32>
    %c0_6 = arith.constant 0 : index
    %c0_7 = arith.constant 0 : index
    %8 = vector.load %arg6[%c0_6, %c0_7] : memref<32x32xf32, #tpu.memory_space<vmem>>, vector<32x32xf32>
    tpu.vector_store %arg6[%c0_6, %c0_7], %7 {strides = array<i32>} : memref<32x32xf32, #tpu.memory_space<vmem>>, vector<32x32xf32>,
    %c0_i32_8 = arith.constant 0 : i32
    %9 = arith.cmpi eq, %arg2, %c0_i32_8 : i32
    %10 = arith.extui %9 : i1 to i32
    %c0_i32_9 = arith.constant 0 : i32
    %11 = arith.cmpi ne, %10, %c0_i32_9 : i32
    scf.if %11 {
      %c0_10 = arith.constant 0 : index
      %c0_11 = arith.constant 0 : index
      %12 = vector.load %arg6[%c0_10, %c0_11] : memref<32x32xf32, #tpu.memory_space<vmem>>, vector<32x32xf32>
      %c0_12 = arith.constant 0 : index
      %c0_13 = arith.constant 0 : index
      %13 = vector.load %arg5[%c0_12, %c0_13] : memref<32x32xf32, #tpu.memory_space<vmem>>, vector<32x32xf32>
      tpu.vector_store %arg5[%c0_12, %c0_13], %12 {strides = array<i32>} : memref<32x32xf32, #tpu.memory_space<vmem>>, vector<32x32xf32>,
    } else {
    }
    return
  }
  func.func @transform_0(%arg0: i32, %arg1: i32, %arg2: i32) -> (i32, i32) {
    %c0_i32 = arith.constant 0 : i32
    return %arg0, %arg2 : i32, i32
  }
  func.func @transform_1(%arg0: i32, %arg1: i32, %arg2: i32) -> (i32, i32) {
    %c0_i32 = arith.constant 0 : i32
    return %arg2, %arg1 : i32, i32
  }
  func.func @transform_2(%arg0: i32, %arg1: i32, %arg2: i32) -> (i32, i32) {
    %c0_i32 = arith.constant 0 : i32
    return %arg0, %arg1 : i32, i32
  }
}

</mosaic_0001>

<bundles_post_ra>
// kernel: self_attention_forward.3
= control target key start
LH: loop header
LB: loop body
LE: loop exit
PB: predicated region body
PF: predicated region fallthrough
CT: control target
= control target key end

     0   :  { %7 = vsyncpa [#allocation4], 0  ;;  %s347_s0 = inlined_call_operand.hbm [shape: f32[32,32], index: 0, kind: input, shape index: {}]   ;;  %s348_s1 = inlined_call_operand.hbm [shape: f32[32,96], index: 1, kind: input, shape index: {}]   ;;  %s349_s2 = inlined_call_operand.vmem [shape: f32[32,96], index: 2, kind: output, shape index: {}]  }
   0x1   :  { %8 = vsyncpa [#allocation6], 0  ;;  %s275_s9 = smov [#allocation3]   ;;  %s227_s13 = scalar_lea.hbm %s347_s0, 512 }
   0x2   :  { %s14_s10 = sshll.u32 %s275_s9, 4  ;;  %p228_p0 = scmp.ne.s32.totalorder %s347_s0, %s227_s13  ;;  %s15_s10 = int_to_ptr.vmem [resolvable:$true] %s14_s10 }
   0x3   :  { %p231_p1 = scmp.lt.u32.totalorder %s227_s13, %s347_s0 }
   0x5   :  { %p233_p2 = pnand %p231_p1, %p228_p0 }
   0x7   :  { %236 = shalt.err (!%p233_p2)
}
   0x8   :  { %s237_s18 = scalar_lea.vmem %s15_s10, 512  ;;  %p242_p4 = scmp.lt.s32.totalorder %s15_s10, %s15_s10 }
   0x9   :  { %p238_p3 = scmp.ne.s32.totalorder %s15_s10, %s237_s18  ;;  %p243_p5 = scmp.lt.s32.totalorder %s237_s18, %s237_s18 }
   0xb   :  { %p244_p6 = por %p243_p5, %p242_p4 }
   0xd   :  { %p245_p7 = pnand %p244_p6, %p238_p3 }
   0xf   :  { %248 = shalt.err (!%p245_p7)
}
  0x10   :  { %s276_s19 = smov 128   ;;  %s277_s20 = smov 8  }
  0x11   :  { %20 = dma.hbm_to_vmem [thread:$0]  %s347_s0, 512, %s15_s10, [#allocation4], %s276_s19, %s276_s19, %s277_s20  }
  0x12   :  { %s278_s23 = smov [#allocation5]   ;;  %s249_s27 = scalar_lea.hbm %s348_s1, 512 }
  0x13   :  { %s26_s24 = sshll.u32 %s278_s23, 4  ;;  %p250_p8 = scmp.ne.s32.totalorder %s348_s1, %s249_s27  ;;  %s27_s24 = int_to_ptr.vmem [resolvable:$true] %s26_s24 }
  0x14   :  { %p253_p9 = scmp.lt.u32.totalorder %s249_s27, %s348_s1 }
  0x16   :  { %p255_p10 = pnand %p253_p9, %p250_p8 }
  0x18   :  { %258 = shalt.err (!%p255_p10)
}
  0x19   :  { %s259_s4 = scalar_lea.vmem %s27_s24, 512  ;;  %p264_p12 = scmp.lt.s32.totalorder %s27_s24, %s27_s24 }
  0x1a   :  { %p260_p11 = scmp.ne.s32.totalorder %s27_s24, %s259_s4  ;;  %p265_p13 = scmp.lt.s32.totalorder %s259_s4, %s259_s4 }
  0x1c   :  { %p266_p0 = por %p265_p13, %p264_p12 }
  0x1e   :  { %p267_p1 = pnand %p266_p0, %p260_p11 }
  0x20   :  { %270 = shalt.err (!%p267_p1)
}
  0x21   :  { %32 = dma.hbm_to_vmem [thread:$0]  %s348_s1, 512, %s27_s24, [#allocation6], %s276_s19, %s276_s19, %s277_s20  }
  0x22   :  { %271 = dma.done.wait [#allocation4], 512  }
  0x23   :  { %272 = vsyncadd [#allocation4], 4294966784 }
  0x24   :  { %273 = dma.done.wait [#allocation6], 512  }
  0x25   :  { %274 = vsyncadd [#allocation6], 4294966784  ;;  %vm43_vm0 = vcmask 785408   ;;  %v279_v0 = vmov 0.0   ;;  %vm60_vm1 = vcmask 261120   ;;  %v56_v1 = vld [vmem:[#allocation5] sm:$0xff] }
  0x26   :  { %45 = vst.msk [vmem:[#allocation2 + $0x8] sm:$0xff] %vm43_vm0, %v279_v0  ;;  %44 = vst.msk [vmem:[#allocation2] sm:$0xff] %vm43_vm0, %v279_v0  ;;  %v57_v2 = vld [vmem:[#allocation5 + $0x8] sm:$0xff]  ;;  %v58_v3 = vld [vmem:[#allocation5 + $0x10] sm:$0xff] }
  0x27   :  { %46 = vst.msk [vmem:[#allocation2 + $0x10] sm:$0xff] %vm43_vm0, %v279_v0  ;;  %47 = vst.msk [vmem:[#allocation2 + $0x18] sm:$0xff] %vm43_vm0, %v279_v0  ;;  %v210_v4 = vpack.c.bf16 %v57_v2, %v56_v1  ;;  %v59_v5 = vld [vmem:[#allocation5 + $0x18] sm:$0xff]  ;;  %v52_v6 = vld [vmem:[#allocation3] sm:$0xff] }
  0x28   :  { %v54_v7 = vld [vmem:[#allocation3 + $0x10] sm:$0xff]  ;;  %v214_v8 = vpack.c.bf16 %v59_v5, %v58_v3  ;;  %204 = vmatprep.mubr.msk.f32.mxu0 %vm60_vm1, %v52_v6  ;;  %v53_v9 = vld [vmem:[#allocation3 + $0x8] sm:$0xff]  ;;  %v55_v10 = vld [vmem:[#allocation3 + $0x18] sm:$0xff] }
  0x29   :  { %207 = vmatprep.mubr.msk.f32.mxu1 %vm60_vm1, %v54_v7  ;;  %211 = vmatprep.subr.bf16.mxu0 %v210_v4 }
  0x2a   :  { %218 = vmatprep.subr.bf16.mxu1 %v210_v4  ;;  %213 = vmatpush3.bf16.msra.mxu0 %v210_v4 }
  0x2b   :  { %220 = vmatpush3.bf16.msra.mxu1 %v210_v4  ;;  %215 = vmatprep.subr.bf16.mxu0 %v214_v8 }
  0x2c   :  { %219 = vmatprep.subr.bf16.mxu1 %v214_v8 }
  0x2d   :  { %v49_v11 = vld [vmem:[#allocation2 + $0x8] sm:$0xff]  ;;  %v48_v13 = vld [vmem:[#allocation2] sm:$0xff] }
  0x2e   :  { %217 = vmatpush3.bf16.msra.mxu0 %v214_v8  ;;  %v51_v12 = vld [vmem:[#allocation2 + $0x18] sm:$0xff]  ;;  %v50_v14 = vld [vmem:[#allocation2 + $0x10] sm:$0xff] }
  0x2f   :  { %221 = vmatpush3.bf16.msra.mxu1 %v214_v8 }
  0x31   :  { %205 = vmatmul.mubr.msk.f32.vlgmr.msra.gmra.mrb[0].mxu0 %vm60_vm1, %v53_v9 }
  0x32   :  { %208 = vmatmul.mubr.msk.f32.vlgmr.msra.gmra.mrb[0].mxu1 %vm60_vm1, %v55_v10 }
 0x104   :  { %v206_v15 = vpop.f32.mrb[0].mxu0 }
 0x105   :  { %v209_v16 = vpop.f32.mrb[0].mxu1  ;;  %v159_v17 = vadd.f32 %v206_v15, %v49_v11  ;;  %v139_v19 = vpop.f32.mrb[1].mxu0 }
 0x106   :  { %v161_v18 = vadd.f32 %v209_v16, %v51_v12  ;;  %v149_v20 = vpop.f32.mrb[1].mxu1  ;;  %v158_v21 = vadd.f32 %v139_v19, %v48_v13 }
 0x107   :  { %v160_v22 = vadd.f32 %v149_v20, %v50_v14  ;;  %164 = vst.msk [vmem:[#allocation2 + $0x8] sm:$0xff] %vm43_vm0, %v159_v17 }
 0x108   :  { %166 = vst.msk [vmem:[#allocation2 + $0x18] sm:$0xff] %vm43_vm0, %v161_v18  ;;  %163 = vst.msk [vmem:[#allocation2] sm:$0xff] %vm43_vm0, %v158_v21 }
 0x109   :  { %165 = vst.msk [vmem:[#allocation2 + $0x10] sm:$0xff] %vm43_vm0, %v160_v22 }
 0x10e   :  { %v171_v23 = vld [vmem:[#allocation2 + $0x8] sm:$0xff] }
 0x10f   :  { %v173_v24 = vld [vmem:[#allocation2 + $0x18] sm:$0xff]  ;;  %175 = vst.msk [vmem:[%s349_s2 + $0x8] sm:$0xff] %vm43_vm0, %v171_v23  ;;  %v170_v25 = vld [vmem:[#allocation2] sm:$0xff] }
 0x110   :  { %177 = vst.msk [vmem:[%s349_s2 + $0x18] sm:$0xff] %vm43_vm0, %v173_v24  ;;  %v172_v26 = vld [vmem:[#allocation2 + $0x10] sm:$0xff]  ;;  %174 = vst.msk [vmem:[%s349_s2] sm:$0xff] %vm43_vm0, %v170_v25 }
 0x111   :  { %176 = vst.msk [vmem:[%s349_s2 + $0x10] sm:$0xff] %vm43_vm0, %v172_v26 }
 0x112   :  { %182 = vsyncpa [#allocation4], 1 }
 0x113   :  { %183 = vsyncpa [#allocation6], 1 }

// kernel: self_attention_forward.5
= control target key start
LH: loop header
LB: loop body
LE: loop exit
PB: predicated region body
PF: predicated region fallthrough
CT: control target
= control target key end

     0   :  { %vm16_vm0 = vcmask 261120   ;;  %v232_v7 = vmov 0.0   ;;  %s303_s0 = inlined_call_operand.vmem [shape: f32[32,32], index: 0, kind: input, shape index: {}]   ;;  %s304_s1 = inlined_call_operand.vmem [shape: f32[32,32], index: 1, kind: input, shape index: {}]   ;;  %s305_s2 = inlined_call_operand.hbm [shape: f32[32,32], index: 2, kind: output, shape index: {}]  }
   0x1   :  { %v29_v0 = vld [vmem:[%s304_s1] sm:$0xff]  ;;  %v30_v1 = vld [vmem:[%s304_s1 + $0x8] sm:$0xff]  ;;  %v31_v2 = vld [vmem:[%s304_s1 + $0x10] sm:$0xff]  ;;  %18 = vst.msk [vmem:[#allocation2 + $0x8] sm:$0xff] %vm16_vm0, %v232_v7 }
   0x2   :  { %v192_v3 = vpack.c.bf16 %v30_v1, %v29_v0  ;;  %v32_v4 = vld [vmem:[%s304_s1 + $0x18] sm:$0xff]  ;;  %v25_v5 = vld [vmem:[%s303_s0] sm:$0xff]  ;;  %v27_v6 = vld [vmem:[%s303_s0 + $0x10] sm:$0xff]  ;;  %17 = vst.msk [vmem:[#allocation2] sm:$0xff] %vm16_vm0, %v232_v7 }
   0x3   :  { %19 = vst.msk [vmem:[#allocation2 + $0x10] sm:$0xff] %vm16_vm0, %v232_v7  ;;  %20 = vst.msk [vmem:[#allocation2 + $0x18] sm:$0xff] %vm16_vm0, %v232_v7  ;;  %v196_v8 = vpack.c.bf16 %v32_v4, %v31_v2  ;;  %186 = vmatprep.mubr.msk.f32.mxu0 %vm16_vm0, %v25_v5  ;;  %189 = vmatprep.mubr.msk.f32.mxu1 %vm16_vm0, %v27_v6 }
   0x4   :  { %7 = vsyncpa [#allocation4], 0  ;;  %193 = vmatprep.subr.bf16.mxu0 %v192_v3  ;;  %200 = vmatprep.subr.bf16.mxu1 %v192_v3  ;;  %v26_v9 = vld [vmem:[%s303_s0 + $0x8] sm:$0xff]  ;;  %v28_v10 = vld [vmem:[%s303_s0 + $0x18] sm:$0xff]  ;;  %s233_s0 = smov [#allocation3]  }
   0x5   :  { %195 = vmatpush3.bf16.msra.mxu0 %v192_v3  ;;  %202 = vmatpush3.bf16.msra.mxu1 %v192_v3  ;;  %s155_s24 = sshll.u32 %s233_s0, 4  ;;  %s156_s24 = int_to_ptr.vmem [resolvable:$true] %s155_s24 }
   0x6   :  { %197 = vmatprep.subr.bf16.mxu0 %v196_v8  ;;  %201 = vmatprep.subr.bf16.mxu1 %v196_v8  ;;  %s208_s25 = scalar_lea.vmem %s156_s24, 512  ;;  %p213_p1 = scmp.lt.s32.totalorder %s156_s24, %s156_s24 }
   0x7   :  { %p209_p0 = scmp.ne.s32.totalorder %s156_s24, %s208_s25  ;;  %p214_p2 = scmp.lt.s32.totalorder %s208_s25, %s208_s25 }
   0x8   :  { %v22_v11 = vld [vmem:[#allocation2 + $0x8] sm:$0xff] }
   0x9   :  { %199 = vmatpush3.bf16.msra.mxu0 %v196_v8  ;;  %203 = vmatpush3.bf16.msra.mxu1 %v196_v8  ;;  %v21_v13 = vld [vmem:[#allocation2] sm:$0xff]  ;;  %p215_p3 = por %p214_p2, %p213_p1 }
   0xa   :  { %v24_v12 = vld [vmem:[#allocation2 + $0x18] sm:$0xff]  ;;  %v23_v14 = vld [vmem:[#allocation2 + $0x10] sm:$0xff] }
   0xb   :  { %p216_p4 = pnand %p215_p3, %p209_p0 }
   0xc   :  { %187 = vmatmul.mubr.msk.f32.vlgmr.msra.gmra.mrb[0].mxu0 %vm16_vm0, %v26_v9  ;;  %190 = vmatmul.mubr.msk.f32.vlgmr.msra.gmra.mrb[0].mxu1 %vm16_vm0, %v28_v10 }
  0xdf   :  { %v188_v15 = vpop.f32.mrb[0].mxu0  ;;  %v191_v16 = vpop.f32.mrb[0].mxu1 }
  0xe0   :  { %v132_v17 = vadd.f32 %v188_v15, %v22_v11  ;;  %v134_v18 = vadd.f32 %v191_v16, %v24_v12  ;;  %v112_v19 = vpop.f32.mrb[1].mxu0  ;;  %v122_v20 = vpop.f32.mrb[1].mxu1 }
  0xe1   :  { %v131_v21 = vadd.f32 %v112_v19, %v21_v13  ;;  %v133_v22 = vadd.f32 %v122_v20, %v23_v14 }
  0xe2   :  { %136 = vst.msk [vmem:[#allocation2 + $0x8] sm:$0xff] %vm16_vm0, %v132_v17  ;;  %138 = vst.msk [vmem:[#allocation2 + $0x18] sm:$0xff] %vm16_vm0, %v134_v18 }
  0xe3   :  { %135 = vst.msk [vmem:[#allocation2] sm:$0xff] %vm16_vm0, %v131_v21  ;;  %137 = vst.msk [vmem:[#allocation2 + $0x10] sm:$0xff] %vm16_vm0, %v133_v22 }
  0xe9   :  { %v143_v23 = vld [vmem:[#allocation2 + $0x8] sm:$0xff]  ;;  %v145_v24 = vld [vmem:[#allocation2 + $0x18] sm:$0xff] }
  0xea   :  { %v142_v25 = vld [vmem:[#allocation2] sm:$0xff]  ;;  %v144_v26 = vld [vmem:[#allocation2 + $0x10] sm:$0xff]  ;;  %147 = vst.msk [vmem:[#allocation3 + $0x8] sm:$0xff] %vm16_vm0, %v143_v23  ;;  %149 = vst.msk [vmem:[#allocation3 + $0x18] sm:$0xff] %vm16_vm0, %v145_v24 }
  0xeb   :  { %146 = vst.msk [vmem:[#allocation3] sm:$0xff] %vm16_vm0, %v142_v25  ;;  %148 = vst.msk [vmem:[#allocation3 + $0x10] sm:$0xff] %vm16_vm0, %v144_v26 }
  0xec   :  { %219 = shalt.err (!%p216_p4)
}
  0xed   :  { %s220_s28 = scalar_lea.hbm %s305_s2, 512 }
  0xee   :  { %p221_p5 = scmp.ne.s32.totalorder %s305_s2, %s220_s28  ;;  %p224_p6 = scmp.lt.u32.totalorder %s220_s28, %s305_s2 }
  0xf0   :  { %p226_p7 = pnand %p224_p6, %p221_p5 }
  0xf2   :  { %229 = shalt.err (!%p226_p7)
}
  0xf3   :  { %s234_s5 = smov 128   ;;  %s235_s6 = smov 8  }
  0xf4   :  { %161 = dma.vmem_to_hbm [thread:$0]  %s156_s24, 512, %s305_s2, [#allocation4], %s234_s5, %s234_s5, %s235_s6  }
  0xf5   :  { %230 = dma.done.wait [#allocation4], 512  }
  0xf6   :  { %231 = vsyncadd [#allocation4], 4294966784 }
  0xf7   :  { %165 = vsyncpa [#allocation4], 1 }

// kernel: self_attention_forward.4
= control target key start
LH: loop header
LB: loop body
LE: loop exit
PB: predicated region body
PF: predicated region fallthrough
CT: control target
= control target key end

     0   :  { %s1678_s0 = inlined_call_operand.vmem [shape: f32[2,16,4,1,8], index: 0, kind: input, shape index: {}]   ;;  %s1679_s1 = inlined_call_operand.vmem [shape: f32[4,4,32,8], index: 1, kind: input, shape index: {}]   ;;  %s1680_s2 = inlined_call_operand.vmem [shape: f32[4,4,32,8], index: 2, kind: input, shape index: {}]   ;;  %s1681_s3 = inlined_call_operand.vmem [shape: f32[2,16,4,1,8], index: 3, kind: output, shape index: {}]  }
   0x1   :  { %1684 = sst [smem:[#allocation10_spill]] %s1678_s0 }
   0x2   :  { %s1426_s12 = smov 0   ;;  %s1428_s13 = smov 0  }
   0x3   :  { %s1430_s14 = smov 0   ;;  %s1432_s15 = smov 0  }
   0x4   :  { %s1434_s16 = smov 0   ;;  %s1436_s17 = smov 0  }
   0x5   :  { %s1438_s18 = smov 0   ;;  %s1440_s19 = smov 0  }
   0x6   :  { %s1442_s20 = smov 0  }
   0x7 LB: > { %s28_s21 = sadd.s32 1, %s1386_s17  ;;  %s35_s22 = sadd.s32 1, %s1390_s18  ;;  %s1398_s20 = sphi %s1442_s20, %s13_s20   ;;  %s1394_s19 = sphi %s1440_s19, %s1699_s19   ;;  %s1390_s18 = sphi %s1438_s18, %s1698_s18   ;;  %s1386_s17 = sphi %s1436_s17, %s1697_s17   ;;  %s1382_s16 = sphi %s1434_s16, %s1696_s16   ;;  %s1378_s15 = sphi %s1432_s15, %s1695_s15   ;;  %s1374_s14 = sphi %s1430_s14, %s1694_s14   ;;  %s1370_s13 = sphi %s1428_s13, %s1693_s13   ;;  %s1366_s12 = sphi %s1426_s12, %s1692_s12  }
   0x8   : > { %p29_p0 = scmp.ge.s32.totalorder %s28_s21, 2  ;;  %s1193_s23 = sadd.s32 4294967295, %s1398_s20  }
   0x9   : > { %s39_s24 = sadd.s32 1, %s1394_s19  ;;  %p57_p1 = scmp.ne.s32.totalorder %s1370_s13, %s1366_s12 }
   0xa   : > { %s1701_s21 = smov (%p29_p0, %s28_s21), 0  ;;  %s1703_s22 = smov (!%p29_p0, %s35_s22), %s1390_s18 }
   0xb   : > { %p58_p2 = scmp.eq.s32.totalorder %s1398_s20, 0  ;;  %p37_p3 = scmp.ge.s32.totalorder %s1703_s22, 4 }
   0xc   : > { %p151_p4 = scmp.eq.s32.totalorder %s1193_s23, 15  ;;  %s50_s30 = sadd.s32 1, %s1370_s13 }
   0xd   : > { %p1481_p5 = por %p58_p2, %p57_p1  ;;  %s1705_s22 = smov (%p37_p3, %s1703_s22), 0 }
   0xe   : > { %1686 = sst [smem:[#allocation8_spill]] %s1705_s22  ;;  %s1707_s24 = smov (!%p37_p3, %s39_s24), %s1394_s19 }
   0xf   : > { %p1488_p6 = por %p151_p4, %p57_p1  ;;  %p41_p7 = scmp.ge.s32.totalorder %s1707_s24, 2 }
  0x10   : > { %s46_s27 = ssub.s32 %s1390_s18, %s1705_s22  ;;  %p1196_p9 = scmp.ge.s32.totalorder %s1398_s20, 16 }
  0x11   : > { %s1709_s24 = smov (%p41_p7, %s1707_s24), 0 }
  0x12   : > { %1688 = sst [smem:[#allocation9_spill]] %s1709_s24  ;;  %s43_s28 = ssub.s32 %s1394_s19, %s1709_s24 }
  0x13   : > { %s47_s29 = sor.u32 %s46_s27, %s43_s28  ;;  %173 = sbr.rel (%p1196_p9) target bundleno = 46 (0x2e), region = 16 }
  0x14   : > { %p48_p8 = scmp.eq.s32.totalorder %s47_s29, 0 }
  0x16   : > { %s1500_s4 = scalar_select %p48_p8, %s1370_s13, %s50_s30  }
  0x1a   : > { %176 = sbr.rel (!%p1481_p5) target bundleno = 46 (0x2e), region = 20  ;;  %s178_s5 = sand.u32 (%p1481_p5), 1, %s1370_s13  }
  0x1b   : > { %s1198_s6 = sshll.u32 (%p1481_p5), %s1394_s19, 6  ;;  %s1197_s7 = sshll.u32 (%p1481_p5), %s178_s5, 4 }
  0x1c   : > { %s185_s8 = sadd.s32 (%p1481_p5), %s1390_s18, %s1198_s6  ;;  %s1689_s0 = sld [smem:[#allocation10_spill]] (%p1481_p5) }
  0x1d   : > { %s180_s23 = scalar_lea.vmem (%p1481_p5), [#allocation6], %s1197_s7 }
  0x22   : > { %s1511_s11 = scalar_lea.vmem %s1689_s0, %s185_s8 }
  0x23   : > { %v202_v0 = vld [vmem:[%s1511_s11] sm:$0x1]  ;;  %v204_v1 = vld [vmem:[%s1511_s11 + $0x4] sm:$0x1]  ;;  %v206_v2 = vld [vmem:[%s1511_s11 + $0x8] sm:$0x1] }
  0x24   : > { %203 = vst [vmem:[%s180_s23] sm:$0x1] %v202_v0  ;;  %205 = vst [vmem:[%s180_s23 + $0x1] sm:$0x1] %v204_v1  ;;  %v208_v3 = vld [vmem:[%s1511_s11 + $0xc] sm:$0x1] }
  0x25   : > { %207 = vst [vmem:[%s180_s23 + $0x2] sm:$0x1] %v206_v2  ;;  %v210_v4 = vld [vmem:[%s1511_s11 + $0x10] sm:$0x1]  ;;  %v212_v5 = vld [vmem:[%s1511_s11 + $0x14] sm:$0x1] }
  0x26   : > { %209 = vst [vmem:[%s180_s23 + $0x3] sm:$0x1] %v208_v3  ;;  %211 = vst [vmem:[%s180_s23 + $0x4] sm:$0x1] %v210_v4  ;;  %v214_v6 = vld [vmem:[%s1511_s11 + $0x18] sm:$0x1] }
  0x27   : > { %213 = vst [vmem:[%s180_s23 + $0x5] sm:$0x1] %v212_v5  ;;  %v216_v7 = vld [vmem:[%s1511_s11 + $0x1c] sm:$0x1]  ;;  %v218_v8 = vld [vmem:[%s1511_s11 + $0x20] sm:$0x1] }
  0x28   : > { %215 = vst [vmem:[%s180_s23 + $0x6] sm:$0x1] %v214_v6  ;;  %217 = vst [vmem:[%s180_s23 + $0x7] sm:$0x1] %v216_v7  ;;  %v220_v9 = vld [vmem:[%s1511_s11 + $0x24] sm:$0x1] }
  0x29   : > { %219 = vst [vmem:[%s180_s23 + $0x8] sm:$0x1] %v218_v8  ;;  %v222_v10 = vld [vmem:[%s1511_s11 + $0x28] sm:$0x1]  ;;  %v224_v11 = vld [vmem:[%s1511_s11 + $0x2c] sm:$0x1] }
  0x2a   : > { %221 = vst [vmem:[%s180_s23 + $0x9] sm:$0x1] %v220_v9  ;;  %223 = vst [vmem:[%s180_s23 + $0xa] sm:$0x1] %v222_v10  ;;  %v226_v12 = vld [vmem:[%s1511_s11 + $0x30] sm:$0x1] }
  0x2b   : > { %225 = vst [vmem:[%s180_s23 + $0xb] sm:$0x1] %v224_v11  ;;  %v228_v13 = vld [vmem:[%s1511_s11 + $0x34] sm:$0x1]  ;;  %v230_v14 = vld [vmem:[%s1511_s11 + $0x38] sm:$0x1] }
  0x2c   : > { %227 = vst [vmem:[%s180_s23 + $0xc] sm:$0x1] %v226_v12  ;;  %229 = vst [vmem:[%s180_s23 + $0xd] sm:$0x1] %v228_v13  ;;  %v232_v15 = vld [vmem:[%s1511_s11 + $0x3c] sm:$0x1] }
  0x2d   : > { %231 = vst [vmem:[%s180_s23 + $0xe] sm:$0x1] %v230_v14  ;;  %233 = vst [vmem:[%s180_s23 + $0xf] sm:$0x1] %v232_v15 }
  0x2e PF: > { %p1199_p10 = scmp.ge.s32.totalorder %s1398_s20, 1  ;;  %p317_p11 = scmp.lt.s32.totalorder %s1398_s20, 17 }
  0x30   : > { %p318_p12 = pnand %p1199_p10, %p317_p11 }
  0x31   : > { %s324_s25 = sand.u32 (!%p318_p12), 1, %s1366_s12   ;;  %p371_p13 = scmp.lt.s32.totalorder (!%p318_p12), %s1382_s16, 3 }
  0x32   : > { %321 = sbr.rel (%p318_p12) target bundleno = 915 (0x393), region = 69  ;;  %s1200_s27 = sshll.u32 (!%p318_p12), %s324_s25, 4 }
  0x33   : > { %p373_p0 = scmp.lt.s32.totalorder (!%p318_p12), %s1378_s15, 3  ;;  %p375_p1 = scmp.lt.s32.totalorder (!%p318_p12), %s1374_s14, 3 }
  0x34   : > { %s1548_s25 = scalar_lea.vmem (!%p318_p12), [#allocation6], %s1200_s27  ;;  %s1550_s22 = scalar_lea.vmem (!%p318_p12), [#allocation7], %s1200_s27 }
  0x35   : > { %p1208_p2 = scmp.ne.s32.totalorder (!%p318_p12), %s1374_s14, 0 }
  0x39   : > { %s372_s28 = scalar_select %p371_p13, %s1382_s16, 3 }
  0x3a   : > { %s374_s29 = scalar_select %p373_p0, %s1378_s15, 3 }
  0x3b   : > { %s1203_s5 = sshll.u32 %s372_s28, 4  ;;  %v400_v16 = vld [vmem:[%s1548_s25] sm:$0x1] (!%p1208_p2)  ;;  %v401_v17 = vld [vmem:[%s1548_s25 + $0x1] sm:$0x1] (!%p1208_p2)  ;;  %v455_v25 = vlaneseq (!%p1208_p2)  ;;  %vm548_vm0 = vcmask (!%p1208_p2), 64512  }
  0x3c   : > { %s1202_s30 = sshll.u32 %s374_s29, 2  ;;  %399 = sbr.rel (%p1208_p2) target bundleno = 85 (0x55), region = 77  ;;  %v402_v18 = vld [vmem:[%s1548_s25 + $0x2] sm:$0x1] (!%p1208_p2)  ;;  %v403_v19 = vld [vmem:[%s1548_s25 + $0x3] sm:$0x1] (!%p1208_p2) }
  0x3d   : > { %s376_s6 = scalar_select %p375_p1, %s1374_s14, 3 }
  0x3e   : > { %v404_v20 = vld [vmem:[%s1548_s25 + $0x4] sm:$0x1] (!%p1208_p2)  ;;  %v405_v21 = vld [vmem:[%s1548_s25 + $0x5] sm:$0x1] (!%p1208_p2)  ;;  %v406_v22 = vld [vmem:[%s1548_s25 + $0x6] sm:$0x1] (!%p1208_p2) }
  0x3f   : > { %s378_s7 = sadd.s32 %s1202_s30, %s376_s6  ;;  %v407_v23 = vld [vmem:[%s1548_s25 + $0x7] sm:$0x1] (!%p1208_p2)  ;;  %v416_v24 = vmul.f32 (!%p1208_p2), 0.35355338, %v400_v16  ;;  %v417_v26 = vmul.f32 (!%p1208_p2), 0.35355338, %v401_v17 }
  0x40   : > { %s380_s8 = sadd.s32 %s1203_s5, %s378_s7  ;;  %v418_v27 = vmul.f32 (!%p1208_p2), 0.35355338, %v402_v18  ;;  %v419_v28 = vmul.f32 (!%p1208_p2), 0.35355338, %v403_v19  ;;  %v420_v29 = vmul.f32 (!%p1208_p2), 0.35355338, %v404_v20 }
  0x41   : > { %s1204_s9 = sshll.u32 %s380_s8, 3  ;;  %v421_v30 = vmul.f32 (!%p1208_p2), 0.35355338, %v405_v21  ;;  %v422_v31 = vmul.f32 (!%p1208_p2), 0.35355338, %v406_v22  ;;  %v456_v36 = vshrl.u32 (!%p1208_p2), %v455_v25, 7  ;;  %v448_v39 = vcombine.low (!%p1208_p2), %v416_v24, %v417_v26 }
  0x42   : > { %s1541_s23 = scalar_lea.vmem %s1679_s1, %s1204_s9  ;;  %s1546_s12 = scalar_lea.vmem %s1680_s2, %s1204_s9  ;;  %v423_v32 = vmul.f32 (!%p1208_p2), 0.35355338, %v407_v23  ;;  %v408_v33 = vld [vmem:[%s1548_s25 + $0x8] sm:$0x1] (!%p1208_p2)  ;;  %v1400_v34 = vmov (!%p1208_p2), 1966171168   ;;  %v449_v40 = vcombine.low (!%p1208_p2), %v418_v27, %v419_v28 }
  0x43   : > { %v453_v35 = vunpack.c.l.s4 %v1400_v34  ;;  %v409_v37 = vld [vmem:[%s1548_s25 + $0x9] sm:$0x1]  ;;  %v410_v38 = vld [vmem:[%s1548_s25 + $0xa] sm:$0x1]  ;;  %v411_v41 = vld [vmem:[%s1548_s25 + $0xb] sm:$0x1]  ;;  %v450_v44 = vcombine.low %v420_v29, %v421_v30 }
  0x44   : > { %v412_v42 = vld [vmem:[%s1548_s25 + $0xc] sm:$0x1]  ;;  %v413_v43 = vld [vmem:[%s1548_s25 + $0xd] sm:$0x1]  ;;  %v451_v45 = vcombine.low %v422_v31, %v423_v32  ;;  %v414_v47 = vld [vmem:[%s1548_s25 + $0xe] sm:$0x1] }
  0x45   : > { %v454_v46 = vunpack.c.0.s8 %v453_v35  ;;  %v415_v48 = vld [vmem:[%s1548_s25 + $0xf] sm:$0x1]  ;;  %v424_v49 = vmul.f32 0.35355338, %v408_v33  ;;  %v425_v50 = vmul.f32 0.35355338, %v409_v37 }
  0x46   : > { %v426_v51 = vmul.f32 0.35355338, %v410_v38  ;;  %v427_v52 = vmul.f32 0.35355338, %v411_v41  ;;  %v428_v54 = vmul.f32 0.35355338, %v412_v42 }
  0x47   : > { %v457_v53 = vsub.s32 %v454_v46, %v456_v36  ;;  %v429_v55 = vmul.f32 0.35355338, %v413_v43  ;;  %v430_v56 = vmul.f32 0.35355338, %v414_v47  ;;  %v431_v57 = vmul.f32 0.35355338, %v415_v48 }
  0x48   : > { %v497_v58 = vcombine.low %v424_v49, %v425_v50  ;;  %v498_v59 = vcombine.low %v426_v51, %v427_v52  ;;  %vm551_vm1 = vcmask 7168   ;;  %v1401_v9 = vmov -inf  }
  0x49   : > { %v458_v60 = vrot.slane %v448_v39, %v457_v53  ;;  %v465_v61 = vrot.slane %v449_v40, %v457_v53  ;;  %v472_v62 = vrot.slane %v450_v44, %v457_v53  ;;  %v479_v63 = vrot.slane %v451_v45, %v457_v53  ;;  %552 = vst.msk [vmem:[#allocation3] sm:$0xff] %vm551_vm1, %v1401_v9 }
  0x4a   : > { %v499_v0 = vcombine.low %v428_v54, %v429_v55  ;;  %v500_v1 = vcombine.low %v430_v56, %v431_v57  ;;  %v507_v2 = vrot.slane %v497_v58, %v457_v53  ;;  %v514_v3 = vrot.slane %v498_v59, %v457_v53  ;;  %553 = vst.msk [vmem:[#allocation3 + $0x8] sm:$0xff] %vm551_vm1, %v1401_v9 }
  0x4b   : > { %v480_v4 = vcombine.low %v458_v60, %v465_v61  ;;  %v481_v5 = vcombine.low %v472_v62, %v479_v63  ;;  %v1402_v10 = vmov 0.0  }
  0x4c   : > { %v521_v6 = vrot.slane %v499_v0, %v457_v53  ;;  %v528_v7 = vrot.slane %v500_v1, %v457_v53  ;;  %v529_v8 = vcombine.low %v507_v2, %v514_v3  ;;  %554 = vst.msk [vmem:[#allocation4] sm:$0xff] %vm551_vm1, %v1402_v10  ;;  %555 = vst.msk [vmem:[#allocation4 + $0x8] sm:$0xff] %vm551_vm1, %v1402_v10 }
  0x4d   : > { %556 = vst.msk [vmem:[#allocation5] sm:$0xff] %vm548_vm0, %v1402_v10  ;;  %557 = vst.msk [vmem:[#allocation5 + $0x8] sm:$0xff] %vm548_vm0, %v1402_v10  ;;  %v488_v11 = vrot.slane %v480_v4, %v457_v53  ;;  %v495_v12 = vrot.slane %v481_v5, %v457_v53 }
  0x4e   : > { %v530_v13 = vcombine.low %v521_v6, %v528_v7  ;;  %v537_v14 = vrot.slane %v529_v8, %v457_v53 }
  0x4f   : > { %v496_v15 = vcombine.low %v488_v11, %v495_v12 }
  0x50   : > { %v544_v16 = vrot.slane %v530_v13, %v457_v53 }
  0x51   : > { %549 = vst.msk [vmem:[#allocation2] sm:$0xff] %vm548_vm0, %v496_v15 }
  0x52   : > { %v545_v17 = vcombine.low %v537_v14, %v544_v16 }
  0x54   : > { %550 = vst.msk [vmem:[#allocation2 + $0x8] sm:$0xff] %vm548_vm0, %v545_v17 }
  0x55 PF: > { %v558_v18 = vld [vmem:[%s1541_s23] sm:$0xff]  ;;  %vm562_vm2 = vcmask 64512   ;;  %v1403_v25 = vmov 0   ;;  %v647_v26 = vld [vmem:[#allocation3] sm:$0xff]  ;;  %vm691_vm3 = vcmask 7168   ;;  %v648_v29 = vld [vmem:[#allocation3 + $0x8] sm:$0xff] }
  0x56   : > { %1225 = vmatprep.subr.msk.mxu0 %vm562_vm2, %v558_v18  ;;  %1313 = vset.pattern.permute.xlu1 %v1403_v25  ;;  %v559_v34 = vld [vmem:[%s1546_s12] sm:$0xff]  ;;  %v680_v52 = vld [vmem:[#allocation4 + $0x8] sm:$0xff]  ;;  %v695_v57 = vld [vmem:[#allocation5 + $0x8] sm:$0xff]  ;;  %p1214_p3 = scmp.ne.s32.totalorder %s1374_s14, 1 }
  0x57   : > { %1226 = vmatpush3.xpose.msk.msra.mxu0 %vm562_vm2, %v558_v18  ;;  %1314 = vset.pattern.permute.xlu0 %v1403_v25  ;;  %v679_v49 = vld [vmem:[#allocation4] sm:$0xff]  ;;  %v694_v59 = vld [vmem:[#allocation5] sm:$0xff]  ;;  %v1404_v4 = vmov (!%p1214_p3), 0   ;;  %v1405_v7 = vmov (!%p1214_p3), 1966171168   ;;  %v823_v9 = vlaneseq (!%p1214_p3)  ;;  %vm933_vm4 = vcmask (!%p1214_p3), 57344  }
  0x58   : > { %v560_v19 = vld [vmem:[#allocation2] sm:$0xff]  ;;  %1230 = vmatprep.subr.mxu1 %v559_v34  ;;  %v821_v8 = vunpack.c.l.s4 (!%p1214_p3), %v1405_v7 }
  0x59   : > { %1227 = vmatprep.mubr.msk.f32.mxu0 %vm562_vm2, %v560_v19  ;;  %1231 = vmatpush3.msra.mxu1 %v559_v34  ;;  %v824_v12 = vshrl.u32 (!%p1214_p3), %v823_v9, 7 }
  0x5a   : > { %v822_v11 = vunpack.c.0.s8 (!%p1214_p3), %v821_v8 }
  0x5b   : > { %v561_v20 = vld [vmem:[#allocation2 + $0x8] sm:$0xff] }
  0x5c   : > { %1228 = vmatmul.mubr.msk.f32.vlgmr.msra.gmra.mrb[0].mxu0 %vm562_vm2, %v561_v20  ;;  %v825_v14 = vsub.s32 (!%p1214_p3), %v822_v11, %v824_v12 }
 0x12f   : > { %v1229_v21 = vpop.f32.mrb[0].mxu0 }
 0x130   : > { %v638_v22 = vpop.f32.mrb[1].mxu0  ;;  %v652_v24 = vsel %vm562_vm2, %v1229_v21, -inf }
 0x131   : > { %v649_v23 = vsel %vm562_vm2, %v638_v22, -inf }
 0x132   : > { %650 = vmax.xlane.f32.xlu0 %v649_v23 }
 0x136   : > { %653 = vmax.xlane.f32.xlu0 %v652_v24 }
 0x1bf   : > { %v651_v27 = vpop.xlane.xlu0 %650 }
 0x1c0   : > { %v655_v28 = vmax.f32 %v647_v26, %v651_v27 }
 0x1c2   : > { %v657_v30 = vsub.f32 %v647_v26, %v655_v28  ;;  %793 = vst.msk [vmem:[#allocation3] sm:$0xff] %vm691_vm3, %v655_v28  ;;  %665 = vperm.xlu1 %1313, %v655_v28  }
 0x1c3   : > { %v654_v31 = vpop.xlane.xlu0 %653 }
 0x1c4   : > { %v656_v32 = vmax.f32 %v648_v29, %v654_v31  ;;  %v659_v46 = vmul.f32 1.442695, %v657_v30 }
 0x1c6   : > { %v658_v33 = vsub.f32 %v648_v29, %v656_v32  ;;  %794 = vst.msk [vmem:[#allocation3 + $0x8] sm:$0xff] %vm691_vm3, %v656_v32  ;;  %670 = vperm.xlu1 %1313, %v656_v32  }
 0x1c8   : > { %v661_v45 = vmul.f32 1.442695, %v658_v33 }
 0x241   : > { %v666_v35 = vpop.permute.xlu1 %665 }
 0x242   : > { %v673_v36 = vsub.f32 %v638_v22, %v666_v35 }
 0x244   : > { %v675_v37 = vmul.f32 1.442695, %v673_v36 }
 0x245   : > { %v671_v38 = vpop.permute.xlu1 %670 }
 0x246   : > { %1315 = vpow2.f32 %v675_v37  ;;  %v674_v39 = vsub.f32 %v1229_v21, %v671_v38 }
 0x248   : > { %v677_v40 = vmul.f32 1.442695, %v674_v39 }
 0x24a   : > { %1317 = vpow2.f32 %v677_v40 }
 0x24b   : > { %1319 = vpow2.f32 %v661_v45 }
 0x24c   : > { %1321 = vpow2.f32 %v659_v46 }
 0x250   : > { %v1316_v41 = vpop.eup %1315 }
 0x251   : > { %1232 = vmatprep.mubr.msk.f32.mxu1 %vm562_vm2, %v1316_v41  ;;  %v683_v42 = vsel %vm562_vm2, %v1316_v41, 0.0 }
 0x252   : > { %684 = vadd.xlane.f32.xlu0 %v683_v42 }
 0x254   : > { %v1318_v43 = vpop.eup %1317 }
 0x255   : > { %1233 = vmatmul.mubr.msk.f32.vlgmr.msra.gmra.mrb[0].mxu1 %vm562_vm2, %v1318_v43  ;;  %v686_v44 = vsel %vm562_vm2, %v1318_v43, 0.0  ;;  %v1320_v47 = vpop.eup %1319 }
 0x256   : > { %687 = vadd.xlane.f32.xlu1 %v686_v44  ;;  %v1322_v48 = vpop.eup %1321  ;;  %v682_v54 = vmul.f32 %v1320_v47, %v680_v52 }
 0x257   : > { %v681_v50 = vmul.f32 %v1322_v48, %v679_v49 }
 0x267   : > { %703 = vperm.xlu1 %1313, %v1320_v47  }
 0x268   : > { %698 = vperm.xlu0 %1314, %v1322_v48  }
 0x26c   : > { %1323 = vset.pattern.permute.xlu0 (!%p1214_p3), %v1404_v4 }
 0x2df   : > { %v685_v51 = vpop.xlane.xlu0 %684 }
 0x2e0   : > { %v689_v53 = vadd.f32 %v685_v51, %v681_v50 }
 0x2e2   : > { %692 = vst.msk [vmem:[#allocation4] sm:$0xff] %vm691_vm3, %v689_v53 }
 0x2e3   : > { %v688_v55 = vpop.xlane.xlu1 %687 }
 0x2e4   : > { %v690_v56 = vadd.f32 %v688_v55, %v682_v54 }
 0x2e6   : > { %693 = vst.msk [vmem:[#allocation4 + $0x8] sm:$0xff] %vm691_vm3, %v690_v56 }
 0x2e7   : > { %v704_v58 = vpop.permute.xlu1 %703  ;;  %v699_v60 = vpop.permute.xlu0 %698 }
 0x2e8   : > { %v707_v61 = vmul.f32 %v704_v58, %v695_v57  ;;  %v706_v62 = vmul.f32 %v699_v60, %v694_v59 }
 0x2e9   : > { %v801_v3 = vld [vmem:[#allocation4] sm:$0xff] (!%p1214_p3) }
 0x2ea   : > { %805 = vperm.xlu0 (!%p1214_p3), %1323, %v801_v3  }
 0x2ed   : > { %v802_v5 = vld [vmem:[#allocation4 + $0x8] sm:$0xff] (!%p1214_p3) }
 0x2ee   : > { %810 = vperm.xlu0 (!%p1214_p3), %1323, %v802_v5  }
 0x326   : > { %798 = sbr.rel (%p1214_p3) target bundleno = 903 (0x387), region = 81 }
 0x328   : > { %v1234_v63 = vpop.f32.mrb[0].mxu1 }
 0x329   : > { %v790_v0 = vadd.f32 %v1234_v63, %v707_v61  ;;  %v780_v1 = vpop.f32.mrb[1].mxu1 }
 0x32a   : > { %v789_v2 = vadd.f32 %v780_v1, %v706_v62 }
 0x32b   : > { %792 = vst.msk [vmem:[#allocation5 + $0x8] sm:$0xff] %vm562_vm2, %v790_v0 }
 0x32c   : > { %791 = vst.msk [vmem:[#allocation5] sm:$0xff] %vm562_vm2, %v789_v2 }
 0x332   : > { %v800_v17 = vld [vmem:[#allocation5 + $0x8] sm:$0xff] }
 0x333   : > { %v799_v13 = vld [vmem:[#allocation5] sm:$0xff] }
 0x369   : > { %v806_v6 = vpop.permute.xlu0 %805 }
 0x36a   : > { %1324 = vrcp.f32 %v806_v6 }
 0x36d   : > { %v811_v10 = vpop.permute.xlu0 %810 }
 0x36e   : > { %1326 = vrcp.f32 %v811_v10 }
 0x374   : > { %v1325_v15 = vpop.eup %1324 }
 0x375   : > { %v814_v16 = vmul.f32 %v1325_v15, %v799_v13 }
 0x377   : > { %v819_v18 = vcombine.high %v814_v16, %v814_v16  ;;  %v826_v19 = vrot.slane %v814_v16, %v825_v14 }
 0x378   : > { %v1327_v20 = vpop.eup %1326 }
 0x379   : > { %v833_v21 = vrot.slane %v819_v18, %v825_v14  ;;  %v834_v22 = vcombine.high %v826_v19, %v826_v19  ;;  %v842_v23 = vrot.slane %v826_v19, %v825_v14  ;;  %v816_v24 = vmul.f32 %v1327_v20, %v800_v17 }
 0x37b   : > { %v835_v25 = vcombine.high %v833_v21, %v833_v21  ;;  %v849_v26 = vrot.slane %v833_v21, %v825_v14  ;;  %v856_v27 = vrot.slane %v834_v22, %v825_v14  ;;  %v864_v28 = vcombine.high %v842_v23, %v842_v23  ;;  %934 = vst.msk [vmem:[%s1550_s22] sm:$0x1] %vm933_vm4, %v842_v23 }
 0x37c   : > { %v868_v29 = vcombine.high %v816_v24, %v816_v24  ;;  %v875_v30 = vrot.slane %v816_v24, %v825_v14 }
 0x37d   : > { %v863_v31 = vrot.slane %v835_v25, %v825_v14  ;;  %v865_v32 = vcombine.high %v849_v26, %v849_v26  ;;  %v866_v33 = vcombine.high %v856_v27, %v856_v27  ;;  %935 = vst.msk [vmem:[%s1550_s22 + $0x1] sm:$0x1] %vm933_vm4, %v856_v27  ;;  %936 = vst.msk [vmem:[%s1550_s22 + $0x2] sm:$0x1] %vm933_vm4, %v864_v28 }
 0x37e   : > { %938 = vst.msk [vmem:[%s1550_s22 + $0x4] sm:$0x1] %vm933_vm4, %v849_v26  ;;  %v882_v34 = vrot.slane %v868_v29, %v825_v14  ;;  %v883_v35 = vcombine.high %v875_v30, %v875_v30  ;;  %v891_v36 = vrot.slane %v875_v30, %v825_v14 }
 0x37f   : > { %v867_v37 = vcombine.high %v863_v31, %v863_v31  ;;  %937 = vst.msk [vmem:[%s1550_s22 + $0x3] sm:$0x1] %vm933_vm4, %v866_v33  ;;  %939 = vst.msk [vmem:[%s1550_s22 + $0x5] sm:$0x1] %vm933_vm4, %v863_v31 }
 0x380   : > { %940 = vst.msk [vmem:[%s1550_s22 + $0x6] sm:$0x1] %vm933_vm4, %v865_v32  ;;  %v884_v38 = vcombine.high %v882_v34, %v882_v34  ;;  %v898_v39 = vrot.slane %v882_v34, %v825_v14  ;;  %v905_v40 = vrot.slane %v883_v35, %v825_v14  ;;  %v913_v41 = vcombine.high %v891_v36, %v891_v36 }
 0x381   : > { %942 = vst.msk [vmem:[%s1550_s22 + $0x8] sm:$0x1] %vm933_vm4, %v891_v36  ;;  %941 = vst.msk [vmem:[%s1550_s22 + $0x7] sm:$0x1] %vm933_vm4, %v867_v37 }
 0x382   : > { %v912_v42 = vrot.slane %v884_v38, %v825_v14  ;;  %v914_v43 = vcombine.high %v898_v39, %v898_v39  ;;  %v915_v44 = vcombine.high %v905_v40, %v905_v40  ;;  %943 = vst.msk [vmem:[%s1550_s22 + $0x9] sm:$0x1] %vm933_vm4, %v905_v40  ;;  %944 = vst.msk [vmem:[%s1550_s22 + $0xa] sm:$0x1] %vm933_vm4, %v913_v41 }
 0x383   : > { %946 = vst.msk [vmem:[%s1550_s22 + $0xc] sm:$0x1] %vm933_vm4, %v898_v39 }
 0x384   : > { %v916_v45 = vcombine.high %v912_v42, %v912_v42  ;;  %945 = vst.msk [vmem:[%s1550_s22 + $0xb] sm:$0x1] %vm933_vm4, %v915_v44  ;;  %947 = vst.msk [vmem:[%s1550_s22 + $0xd] sm:$0x1] %vm933_vm4, %v912_v42 }
 0x385   : > { %948 = vst.msk [vmem:[%s1550_s22 + $0xe] sm:$0x1] %vm933_vm4, %v914_v43 }
 0x386   : > { %949 = vst.msk [vmem:[%s1550_s22 + $0xf] sm:$0x1] %vm933_vm4, %v916_v45 }
 0x387 PF: > { %956 = sbr.rel (!%p1488_p6) target bundleno = 915 (0x393), region = 85  ;;  %s1216_s0 = sshll.u32 (%p1488_p6), %s1382_s16, 6  ;;  %v978_v46 = vld [vmem:[%s1550_s22] sm:$0x1] (%p1488_p6)  ;;  %v980_v47 = vld [vmem:[%s1550_s22 + $0x1] sm:$0x1] (%p1488_p6) }
 0x388   : > { %s961_s14 = sadd.s32 (%p1488_p6), %s1378_s15, %s1216_s0  ;;  %v982_v48 = vld [vmem:[%s1550_s22 + $0x2] sm:$0x1] (%p1488_p6)  ;;  %v984_v49 = vld [vmem:[%s1550_s22 + $0x3] sm:$0x1] (%p1488_p6)  ;;  %v986_v50 = vld [vmem:[%s1550_s22 + $0x4] sm:$0x1] (%p1488_p6) }
 0x389   : > { %s962_s27 = scalar_lea.vmem (%p1488_p6), %s1681_s3, %s961_s14  ;;  %v988_v51 = vld [vmem:[%s1550_s22 + $0x5] sm:$0x1] (%p1488_p6)  ;;  %v990_v52 = vld [vmem:[%s1550_s22 + $0x6] sm:$0x1] (%p1488_p6)  ;;  %v992_v53 = vld [vmem:[%s1550_s22 + $0x7] sm:$0x1] (%p1488_p6) }
 0x38a   : > { %979 = vst [vmem:[%s962_s27] sm:$0x1] (%p1488_p6), %v978_v46  ;;  %981 = vst [vmem:[%s962_s27 + $0x4] sm:$0x1] (%p1488_p6), %v980_v47  ;;  %v994_v54 = vld [vmem:[%s1550_s22 + $0x8] sm:$0x1] (%p1488_p6) }
 0x38b   : > { %983 = vst [vmem:[%s962_s27 + $0x8] sm:$0x1] (%p1488_p6), %v982_v48  ;;  %985 = vst [vmem:[%s962_s27 + $0xc] sm:$0x1] (%p1488_p6), %v984_v49  ;;  %v996_v55 = vld [vmem:[%s1550_s22 + $0x9] sm:$0x1] (%p1488_p6) }
 0x38c   : > { %987 = vst [vmem:[%s962_s27 + $0x10] sm:$0x1] (%p1488_p6), %v986_v50  ;;  %989 = vst [vmem:[%s962_s27 + $0x14] sm:$0x1] (%p1488_p6), %v988_v51  ;;  %v998_v56 = vld [vmem:[%s1550_s22 + $0xa] sm:$0x1] (%p1488_p6) }
 0x38d   : > { %991 = vst [vmem:[%s962_s27 + $0x18] sm:$0x1] (%p1488_p6), %v990_v52  ;;  %993 = vst [vmem:[%s962_s27 + $0x1c] sm:$0x1] (%p1488_p6), %v992_v53  ;;  %v1000_v57 = vld [vmem:[%s1550_s22 + $0xb] sm:$0x1] (%p1488_p6) }
 0x38e   : > { %995 = vst [vmem:[%s962_s27 + $0x20] sm:$0x1] %v994_v54  ;;  %997 = vst [vmem:[%s962_s27 + $0x24] sm:$0x1] %v996_v55  ;;  %v1002_v58 = vld [vmem:[%s1550_s22 + $0xc] sm:$0x1] }
 0x38f   : > { %999 = vst [vmem:[%s962_s27 + $0x28] sm:$0x1] %v998_v56  ;;  %v1004_v59 = vld [vmem:[%s1550_s22 + $0xd] sm:$0x1]  ;;  %1001 = vst [vmem:[%s962_s27 + $0x2c] sm:$0x1] %v1000_v57 }
 0x390   : > { %1003 = vst [vmem:[%s962_s27 + $0x30] sm:$0x1] %v1002_v58  ;;  %1005 = vst [vmem:[%s962_s27 + $0x34] sm:$0x1] %v1004_v59  ;;  %v1006_v60 = vld [vmem:[%s1550_s22 + $0xe] sm:$0x1] }
 0x391   : > { %v1008_v61 = vld [vmem:[%s1550_s22 + $0xf] sm:$0x1]  ;;  %1007 = vst [vmem:[%s962_s27 + $0x38] sm:$0x1] %v1006_v60 }
 0x392   : > { %1009 = vst [vmem:[%s962_s27 + $0x3c] sm:$0x1] %v1008_v61 }
 0x393 PF: > { %s13_s20 = sadd.s32 1, %s1398_s20   ;;  %s1690_s28 = sld [smem:[#allocation8_spill]] }
 0x394   : > { %p10_p4 = scmp.ge.s32.totalorder %s13_s20, 18   ;;  %s1691_s29 = sld [smem:[#allocation9_spill]] }
 0x395   : > { %s1692_s12 = smov %s1370_s13  ;;  %s1693_s13 = smov %s1500_s4 }
 0x396   : > { %s1694_s14 = smov %s1386_s17  ;;  %s1695_s15 = smov %s1390_s18 }
 0x397   : > { %s1696_s16 = smov %s1394_s19  ;;  %s1697_s17 = smov %s1701_s21 }
 0x398   :  { %12 = sbr.rel (!%p10_p4) target bundleno = 7 (0x7), region = 163 }
 0x399   : > { %s1698_s18 = smov %s1690_s28 }
 0x39a   : > { %s1699_s19 = smov %s1691_s29 }

</bundles_post_ra>
